<compile_context>
chip_gen: v6e
topology: v6e:2x2x1
jax: 0.10.0
libtpu: 0.0.40
codegen_flags: <defaults>
</compile_context>

<pallas_src>
import functools

import jax
import jax.numpy as jnp
from jax.experimental import pallas as pl
from jax.experimental.pallas import tpu as pltpu


def _round_up(x, m):
    return (x + m - 1) // m * m


def _vmem_capacity_bytes():
    try:
        return int(pltpu.get_tpu_info().vmem_capacity_bytes)
    except Exception:
        return 128 << 20   # v5e/v6e default if the query is unavailable


_VMEM_CAP = _vmem_capacity_bytes()
# Leave ~25% of physical VMEM for Mosaic internal scratch / f32 temporaries.
_VMEM_BUDGET = max(16 << 20, min(int(0.75 * _VMEM_CAP), 100 << 20))


def adapter_kernel(x_ref, res_ref, g_ref, beta_ref, wd_ref, bd_ref, wu_ref, bu_ref,
                   out_ref, down_ref):
    # LayerNorm statistics in f32 (torch.nn.LayerNorm: biased variance, eps=1e-5).
    # Two-pass (mean -> centered variance) kept on purpose for numerical parity with
    # PyTorch; the kernel is HBM-bound so the serial reduction is not the bottleneck.
    x = x_ref[...].astype(jnp.float32)
    mean = jnp.mean(x, axis=-1, keepdims=True)
    cent = x - mean
    var = jnp.mean(cent * cent, axis=-1, keepdims=True)
    ln = cent * jax.lax.rsqrt(var + 1e-5)
    ln = ln * g_ref[...] + beta_ref[...]          # gamma/beta arrive pre-cast to f32

    # adapter_down: Linear(H -> Dp) + ReLU.  MXU fed in the weight dtype
    # (bf16 weights -> native MXU rate), f32 accumulation.
    wd = wd_ref[...]
    down = jnp.dot(ln.astype(wd.dtype), wd, preferred_element_type=jnp.float32)
    down = jnp.maximum(down + bd_ref[...], 0.0)

    # adapter_up: Linear(Dp -> H) + residual (residual_before_ln=True,
    # add_layer_norm_after=False).  `up` itself is NOT written back; the wrapper
    # derives it as out - residual only when the caller needs it.
    wu = wu_ref[...]
    up = jnp.dot(down.astype(wu.dtype), wu, preferred_element_type=jnp.float32)
    out = up + bu_ref[...] + res_ref[...].astype(jnp.float32)

    out_ref[...] = out.astype(out_ref.dtype)
    down_ref[...] = down.astype(down_ref.dtype)


@functools.partial(jax.jit, static_argnames=("block_tokens", "weight_dtype"))
def adapter_forward(x, residual, gamma, beta, w_down, b_down, w_up, b_up,
                    *, block_tokens=None, weight_dtype=None):
    """x, residual: (B, S, H). Returns (output, down, up) matching the PyTorch module."""
    B, S, H = x.shape
    D = w_down.shape[1]
    N = B * S

    # One-time weight cast (bf16 recommended: native MXU rate, half the VMEM/HBM bytes).
    if weight_dtype is not None:
        w_down = w_down.astype(weight_dtype)
        w_up = w_up.astype(weight_dtype)

    # Keep the `down` output lane-dense: zero-pad the bottleneck dim to a multiple of
    # 128 (padded columns give relu(0) = 0, and the matching zero rows of w_up leave
    # `up` unchanged).
    Dp = _round_up(D, 128)
    if Dp != D:
        w_down = jnp.pad(w_down, ((0, 0), (0, Dp - D)))
        b_down = jnp.pad(b_down, (0, Dp - D))
        w_up = jnp.pad(w_up, ((0, Dp - D), (0, 0)))

    x2 = x.reshape(N, H)
    r2 = residual.reshape(N, H)

    # Small params cast to f32 once here (hoisted out of the per-tile hot path).
    g2 = gamma.reshape(1, H).astype(jnp.float32)
    be2 = beta.reshape(1, H).astype(jnp.float32)
    bd2 = b_down.reshape(1, Dp).astype(jnp.float32)
    bu2 = b_up.reshape(1, H).astype(jnp.float32)

    in_isz = jnp.dtype(x.dtype).itemsize
    w_isz = jnp.dtype(w_down.dtype).itemsize
    # Sublane pack for the token axis: 8 (f32), 16 (bf16), 32 (int8/fp8).
    sub = {4: 8, 2: 16, 1: 32}.get(in_isz, 8)

    if block_tokens is None:
        # Bigger tiles on 128 MiB parts (v5e/v6e); smaller on v7x (64 MiB/TC).
        block_tokens = 1024 if _VMEM_CAP >= (96 << 20) else 256

    tm = max(sub, _round_up(min(block_tokens, _round_up(N, sub)), sub))
    # Prefer >= 4 grid steps so the "parallel" token axis splits evenly across v7x's
    # two TensorCores (and the pipeline has something to overlap).
    if N >= 4 * sub and pl.cdiv(N, tm) < 4:
        tm = _round_up(pl.cdiv(N, 4), sub)

    def footprint(t):
        stream = 2 * (2 * t * H * in_isz + t * H * in_isz + t * Dp * in_isz)  # 2x-buffered x,res,out,down
        temps = t * (3 * H + 2 * Dp) * 4                                      # f32 LN / matmul temporaries
        weights = 2 * H * Dp * w_isz                                          # resident, single-buffered
        params = (3 * H + Dp) * 4
        return stream + temps + weights + params + (2 << 20)                  # + Mosaic scratch headroom

    # Shrink the token tile until the plan fits the generation-aware VMEM budget.
    while footprint(tm) > _VMEM_BUDGET and tm > sub:
        tm = max(sub, _round_up(tm // 2, sub))
    # TODO(synk): if resident weights alone exceed the budget (very large H on v7x),
    # add a K-tiling grid axis for W_down / W_up instead of keeping both fully resident.

    nt = pl.cdiv(N, tm)   # ragged last block is masked by Pallas -> no jnp.pad copies

    # Streaming token tiles (double-buffered by the Pallas pipeline).
    tok = lambda last: pl.BlockSpec((tm, last), lambda i: (i, 0))
    # Resident blocks: constant index map -> fetched once; Buffered(1) -> no pointless
    # double buffer for blocks that never change.
    if hasattr(pl, "Buffered"):
        resident = lambda shape: pl.BlockSpec(shape, lambda i: (0, 0),
                                              pipeline_mode=pl.Buffered(1))
    else:  # older jax fallback
        resident = lambda shape: pl.BlockSpec(shape, lambda i: (0, 0))

    out2, down2 = pl.pallas_call(
        adapter_kernel,
        out_shape=(
            jax.ShapeDtypeStruct((N, H), x.dtype),
            jax.ShapeDtypeStruct((N, Dp), x.dtype),
        ),
        grid_spec=pltpu.PrefetchScalarGridSpec(
            num_scalar_prefetch=0,
            grid=(nt,),
            in_specs=[
                tok(H),                  # x tile
                tok(H),                  # residual tile
                resident((1, H)),        # ln gamma (f32)
                resident((1, H)),        # ln beta  (f32)
                resident((H, Dp)),       # W_down ([in, out])
                resident((1, Dp)),       # b_down (f32)
                resident((Dp, H)),       # W_up   ([in, out])
                resident((1, H)),        # b_up   (f32)
            ],
            out_specs=[tok(H), tok(Dp)],
        ),
        compiler_params=pltpu.CompilerParams(
            dimension_semantics=("parallel",),   # token tiles independent -> 2 TCs on v7x
            vmem_limit_bytes=_VMEM_BUDGET),
    )(x2, r2, g2, be2, w_down, bd2, w_up, bu2)

    output = out2.reshape(B, S, H)
    down = (down2[:, :D] if Dp != D else down2).reshape(B, S, D)
    # `up` derived as output - residual (exact by construction of the kernel's residual
    # add, up to output rounding); DCE'd under jit when the caller only uses output/down.
    up = (output.astype(jnp.float32) - residual.astype(jnp.float32)).astype(x.dtype)
    return output, down, up


def reference_forward(x, residual, gamma, beta, w_down, b_down, w_up, b_up):
    xf = x.astype(jnp.float32)
    mean = jnp.mean(xf, axis=-1, keepdims=True)
    var = jnp.mean((xf - mean) ** 2, axis=-1, keepdims=True)
    ln = (xf - mean) * jax.lax.rsqrt(var + 1e-5) * gamma.astype(jnp.float32) \
        + beta.astype(jnp.float32)
    down = jnp.maximum(ln @ w_down.astype(jnp.float32) + b_down.astype(jnp.float32), 0.0)
    up = down @ w_up.astype(jnp.float32) + b_up.astype(jnp.float32)
    out = up + residual.astype(jnp.float32)
    return out, down, up


if __name__ == "__main__":
    # Small, lane-dense shapes: H and D multiples of 128; N=128 rows exercise a
    # 4-step token pipeline (tm=32).
    B, S, H = 2, 64, 256        # batch, seq, input_size
    D = H // 2                  # down_sample defaults to input_size // 2

    key = jax.random.PRNGKey(0)
    k = jax.random.split(key, 8)

    x = jax.random.normal(k[0], (B, S, H), dtype=jnp.float32)
    residual = jax.random.normal(k[1], (B, S, H), dtype=jnp.float32)
    gamma = 1.0 + 0.1 * jax.random.normal(k[2], (H,), dtype=jnp.float32)
    beta = 0.1 * jax.random.normal(k[3], (H,), dtype=jnp.float32)
    w_down = jax.random.normal(k[4], (H, D), dtype=jnp.float32) * 0.05
    b_down = jax.random.normal(k[5], (D,), dtype=jnp.float32) * 0.05
    w_up = jax.random.normal(k[6], (D, H), dtype=jnp.float32) * 0.05
    b_up = jax.random.normal(k[7], (H,), dtype=jnp.float32) * 0.05

    # --- f32 path: exact module semantics, tight tolerance ---
    out, down, up = adapter_forward(x, residual, gamma, beta,
                                    w_down, b_down, w_up, b_up)
    jax.block_until_ready((out, down, up))
    r_out, r_down, r_up = reference_forward(x, residual, gamma, beta,
                                            w_down, b_down, w_up, b_up)
    assert jnp.allclose(out, r_out, atol=1e-4, rtol=1e-4)
    assert jnp.allclose(down, r_down, atol=1e-4, rtol=1e-4)
    assert jnp.allclose(up, r_up, atol=1e-4, rtol=1e-4)

    # --- bf16 perf path: bf16 activations/outputs + wrapper-cast bf16 weights ---
    xb = x.astype(jnp.bfloat16)
    rb = residual.astype(jnp.bfloat16)
    outb, downb, upb = adapter_forward(xb, rb, gamma, beta,
                                       w_down, b_down, w_up, b_up,
                                       weight_dtype=jnp.bfloat16)
    jax.block_until_ready((outb, downb, upb))
    rb_out, rb_down, rb_up = reference_forward(
        xb, rb, gamma, beta,
        w_down.astype(jnp.bfloat16), b_down, w_up.astype(jnp.bfloat16), b_up)
    assert jnp.allclose(outb.astype(jnp.float32), rb_out, atol=5e-2, rtol=5e-2)
    assert jnp.allclose(downb.astype(jnp.float32), rb_down, atol=5e-2, rtol=5e-2)
    assert jnp.allclose(upb.astype(jnp.float32), rb_up, atol=5e-2, rtol=5e-2)

    print("KERNEL_OK")
</pallas_src>

<mosaic_0001>
module attributes {stable_mosaic.version = 11 : i64} {
  func.func @adapter_kernel(%arg0: i32, %arg1: memref<32x256xf32, #tpu.memory_space<vmem>>, %arg2: memref<32x256xf32, #tpu.memory_space<vmem>>, %arg3: memref<1x256xf32, #tpu.memory_space<vmem>>, %arg4: memref<1x256xf32, #tpu.memory_space<vmem>>, %arg5: memref<256x128xf32, #tpu.memory_space<vmem>>, %arg6: memref<1x128xf32, #tpu.memory_space<vmem>>, %arg7: memref<128x256xf32, #tpu.memory_space<vmem>>, %arg8: memref<1x256xf32, #tpu.memory_space<vmem>>, %arg9: memref<32x256xf32, #tpu.memory_space<vmem>>, %arg10: memref<32x128xf32, #tpu.memory_space<vmem>>) attributes {dimension_semantics = [#tpu.dimension_semantics<parallel>], iteration_bounds = array<i64: 4>, scalar_prefetch = 0 : i64, scratch_operands = 0 : i64, tpu.core_type = #tpu.core_type<tc>, window_params = [{transform_indices = @transform_0, window_bounds = array<i64: 32, 256>}, {transform_indices = @transform_1, window_bounds = array<i64: 32, 256>}, {pipeline_mode = #tpu.pipeline_mode<synchronous>, transform_indices = @transform_2, window_bounds = array<i64: 1, 256>}, {pipeline_mode = #tpu.pipeline_mode<synchronous>, transform_indices = @transform_3, window_bounds = array<i64: 1, 256>}, {pipeline_mode = #tpu.pipeline_mode<synchronous>, transform_indices = @transform_4, window_bounds = array<i64: 256, 128>}, {pipeline_mode = #tpu.pipeline_mode<synchronous>, transform_indices = @transform_5, window_bounds = array<i64: 1, 128>}, {pipeline_mode = #tpu.pipeline_mode<synchronous>, transform_indices = @transform_6, window_bounds = array<i64: 128, 256>}, {pipeline_mode = #tpu.pipeline_mode<synchronous>, transform_indices = @transform_7, window_bounds = array<i64: 1, 256>}, {transform_indices = @transform_8, window_bounds = array<i64: 32, 256>}, {transform_indices = @transform_9, window_bounds = array<i64: 32, 128>}]} {
    %c0 = arith.constant 0 : index
    %c0_0 = arith.constant 0 : index
    %0 = vector.load %arg1[%c0, %c0_0] : memref<32x256xf32, #tpu.memory_space<vmem>>, vector<32x256xf32>
    %cst = arith.constant dense<0.000000e+00> : vector<32xf32>
    %1 = vector.multi_reduction <add>, %0, %cst [1] : vector<32x256xf32> to vector<32xf32>
    %2 = vector.shape_cast %1 : vector<32xf32> to vector<32x1xf32>
    %cst_1 = arith.constant 2.560000e+02 : f32
    %3 = vector.broadcast %cst_1 : f32 to vector<32x1xf32>
    %4 = arith.divf %2, %3 : vector<32x1xf32>
    %5 = vector.broadcast %4 : vector<32x1xf32> to vector<32x256xf32>
    %6 = arith.subf %0, %5 : vector<32x256xf32>
    %7 = arith.mulf %6, %6 : vector<32x256xf32>
    %cst_2 = arith.constant dense<0.000000e+00> : vector<32xf32>
    %8 = vector.multi_reduction <add>, %7, %cst_2 [1] : vector<32x256xf32> to vector<32xf32>
    %9 = vector.shape_cast %8 : vector<32xf32> to vector<32x1xf32>
    %cst_3 = arith.constant 2.560000e+02 : f32
    %10 = vector.broadcast %cst_3 : f32 to vector<32x1xf32>
    %11 = arith.divf %9, %10 : vector<32x1xf32>
    %cst_4 = arith.constant 9.99999974E-6 : f32
    %12 = vector.broadcast %cst_4 : f32 to vector<32x1xf32>
    %13 = arith.addf %11, %12 : vector<32x1xf32>
    %14 = math.rsqrt %13 : vector<32x1xf32>
    %15 = vector.broadcast %14 : vector<32x1xf32> to vector<32x256xf32>
    %16 = arith.mulf %6, %15 : vector<32x256xf32>
    %c0_5 = arith.constant 0 : index
    %c0_6 = arith.constant 0 : index
    %17 = vector.load %arg3[%c0_5, %c0_6] : memref<1x256xf32, #tpu.memory_space<vmem>>, vector<1x256xf32>
    %18 = vector.broadcast %17 : vector<1x256xf32> to vector<32x256xf32>
    %19 = arith.mulf %16, %18 : vector<32x256xf32>
    %c0_7 = arith.constant 0 : index
    %c0_8 = arith.constant 0 : index
    %20 = vector.load %arg4[%c0_7, %c0_8] : memref<1x256xf32, #tpu.memory_space<vmem>>, vector<1x256xf32>
    %21 = vector.broadcast %20 : vector<1x256xf32> to vector<32x256xf32>
    %22 = arith.addf %19, %21 : vector<32x256xf32>
    %c0_9 = arith.constant 0 : index
    %c0_10 = arith.constant 0 : index
    %23 = vector.load %arg5[%c0_9, %c0_10] : memref<256x128xf32, #tpu.memory_space<vmem>>, vector<256x128xf32>
    %cst_11 = arith.constant dense<0.000000e+00> : vector<32x128xf32>
    %24 = tpu.matmul %22, %23, %cst_11 {dimension_numbers = #tpu.dot_dimension_numbers<[1], [0], [0], [1], [0, 0, 1, 1], [], []>} : vector<32x256xf32>, vector<256x128xf32>, vector<32x128xf32> -> vector<32x128xf32>
    %c0_12 = arith.constant 0 : index
    %c0_13 = arith.constant 0 : index
    %25 = vector.load %arg6[%c0_12, %c0_13] : memref<1x128xf32, #tpu.memory_space<vmem>>, vector<1x128xf32>
    %26 = vector.broadcast %25 : vector<1x128xf32> to vector<32x128xf32>
    %27 = arith.addf %24, %26 : vector<32x128xf32>
    %cst_14 = arith.constant 0.000000e+00 : f32
    %28 = vector.broadcast %cst_14 : f32 to vector<32x128xf32>
    %29 = arith.maximumf %27, %28 : vector<32x128xf32>
    %c0_15 = arith.constant 0 : index
    %c0_16 = arith.constant 0 : index
    %30 = vector.load %arg7[%c0_15, %c0_16] : memref<128x256xf32, #tpu.memory_space<vmem>>, vector<128x256xf32>
    %cst_17 = arith.constant dense<0.000000e+00> : vector<32x256xf32>
    %31 = tpu.matmul %29, %30, %cst_17 {dimension_numbers = #tpu.dot_dimension_numbers<[1], [0], [0], [1], [0, 0, 1, 1], [], []>} : vector<32x128xf32>, vector<128x256xf32>, vector<32x256xf32> -> vector<32x256xf32>
    %c0_18 = arith.constant 0 : index
    %c0_19 = arith.constant 0 : index
    %32 = vector.load %arg8[%c0_18, %c0_19] : memref<1x256xf32, #tpu.memory_space<vmem>>, vector<1x256xf32>
    %33 = vector.broadcast %32 : vector<1x256xf32> to vector<32x256xf32>
    %34 = arith.addf %31, %33 : vector<32x256xf32>
    %c0_20 = arith.constant 0 : index
    %c0_21 = arith.constant 0 : index
    %35 = vector.load %arg2[%c0_20, %c0_21] : memref<32x256xf32, #tpu.memory_space<vmem>>, vector<32x256xf32>
    %36 = arith.addf %34, %35 : vector<32x256xf32>
    %c0_22 = arith.constant 0 : index
    %c0_23 = arith.constant 0 : index
    %37 = vector.load %arg9[%c0_22, %c0_23] : memref<32x256xf32, #tpu.memory_space<vmem>>, vector<32x256xf32>
    tpu.vector_store %arg9[%c0_22, %c0_23], %36 {strides = array<i32>} : memref<32x256xf32, #tpu.memory_space<vmem>>, vector<32x256xf32>,
    %c0_24 = arith.constant 0 : index
    %c0_25 = arith.constant 0 : index
    %38 = vector.load %arg10[%c0_24, %c0_25] : memref<32x128xf32, #tpu.memory_space<vmem>>, vector<32x128xf32>
    tpu.vector_store %arg10[%c0_24, %c0_25], %29 {strides = array<i32>} : memref<32x128xf32, #tpu.memory_space<vmem>>, vector<32x128xf32>,
    return
  }
  func.func @transform_0(%arg0: i32) -> (i32, i32) {
    %c0_i32 = arith.constant 0 : i32
    %c0_i32_0 = arith.constant 0 : i32
    return %arg0, %c0_i32 : i32, i32
  }
  func.func @transform_1(%arg0: i32) -> (i32, i32) {
    %c0_i32 = arith.constant 0 : i32
    %c0_i32_0 = arith.constant 0 : i32
    return %arg0, %c0_i32 : i32, i32
  }
  func.func @transform_2(%arg0: i32) -> (i32, i32) {
    %c0_i32 = arith.constant 0 : i32
    %c0_i32_0 = arith.constant 0 : i32
    %c0_i32_1 = arith.constant 0 : i32
    return %c0_i32, %c0_i32_0 : i32, i32
  }
  func.func @transform_3(%arg0: i32) -> (i32, i32) {
    %c0_i32 = arith.constant 0 : i32
    %c0_i32_0 = arith.constant 0 : i32
    %c0_i32_1 = arith.constant 0 : i32
    return %c0_i32, %c0_i32_0 : i32, i32
  }
  func.func @transform_4(%arg0: i32) -> (i32, i32) {
    %c0_i32 = arith.constant 0 : i32
    %c0_i32_0 = arith.constant 0 : i32
    %c0_i32_1 = arith.constant 0 : i32
    return %c0_i32, %c0_i32_0 : i32, i32
  }
  func.func @transform_5(%arg0: i32) -> (i32, i32) {
    %c0_i32 = arith.constant 0 : i32
    %c0_i32_0 = arith.constant 0 : i32
    %c0_i32_1 = arith.constant 0 : i32
    return %c0_i32, %c0_i32_0 : i32, i32
  }
  func.func @transform_6(%arg0: i32) -> (i32, i32) {
    %c0_i32 = arith.constant 0 : i32
    %c0_i32_0 = arith.constant 0 : i32
    %c0_i32_1 = arith.constant 0 : i32
    return %c0_i32, %c0_i32_0 : i32, i32
  }
  func.func @transform_7(%arg0: i32) -> (i32, i32) {
    %c0_i32 = arith.constant 0 : i32
    %c0_i32_0 = arith.constant 0 : i32
    %c0_i32_1 = arith.constant 0 : i32
    return %c0_i32, %c0_i32_0 : i32, i32
  }
  func.func @transform_8(%arg0: i32) -> (i32, i32) {
    %c0_i32 = arith.constant 0 : i32
    %c0_i32_0 = arith.constant 0 : i32
    return %arg0, %c0_i32 : i32, i32
  }
  func.func @transform_9(%arg0: i32) -> (i32, i32) {
    %c0_i32 = arith.constant 0 : i32
    %c0_i32_0 = arith.constant 0 : i32
    return %arg0, %c0_i32 : i32, i32
  }
}

</mosaic_0001>

<bundles_post_ra>
// kernel: sub.1
= control target key start
LH: loop header
LB: loop body
LE: loop exit
PB: predicated region body
PF: predicated region fallthrough
CT: control target
= control target key end

     0   :  { %3 = vsyncpa [#allocation1], 0  ;;  %s420_s15 = smov [#allocation0]   ;;  %s633_s0 = inlined_call_operand.vmem [shape: f32[2,64,256], index: 0, kind: input, shape index: {}]   ;;  %s634_s1 = inlined_call_operand.vmem [shape: f32[2,64,256], index: 1, kind: input, shape index: {}]   ;;  %s635_s2 = inlined_call_operand.hbm [shape: f32[2,64,256], index: 2, kind: output, shape index: {}]  }
   0x1   :  { %v4_v0 = vld [vmem:[%s633_s0] sm:$0xff]  ;;  %v335_v5 = vld [vmem:[%s633_s0 + $0x10] sm:$0xff]  ;;  %v363_v48 = vld [vmem:[%s633_s0 + $0x8] sm:$0xff]  ;;  %s324_s16 = sshll.u32 %s420_s15, 4  ;;  %s325_s16 = int_to_ptr.vmem [resolvable:$true] %s324_s16 }
   0x2   :  { %v5_v1 = vld [vmem:[%s634_s1] sm:$0xff]  ;;  %v336_v7 = vld [vmem:[%s634_s1 + $0x10] sm:$0xff]  ;;  %v364_v49 = vld [vmem:[%s634_s1 + $0x8] sm:$0xff]  ;;  %p403_p1 = scmp.lt.s32.totalorder %s325_s16, %s325_s16 }
   0x3   :  { %v8_v2 = vsub.f32 %v4_v0, %v5_v1  ;;  %v333_v3 = vld [vmem:[%s633_s0 + $0x80] sm:$0xff]  ;;  %v337_v8 = vld [vmem:[%s633_s0 + $0x90] sm:$0xff]  ;;  %v27_v10 = vsub.f32 %v335_v5, %v336_v7  ;;  %v365_v50 = vld [vmem:[%s633_s0 + $0x88] sm:$0xff]  ;;  %v167_v51 = vsub.f32 %v363_v48, %v364_v49 }
   0x4   :  { %v334_v4 = vld [vmem:[%s634_s1 + $0x80] sm:$0xff]  ;;  %v338_v9 = vld [vmem:[%s634_s1 + $0x90] sm:$0xff]  ;;  %v366_v52 = vld [vmem:[%s634_s1 + $0x88] sm:$0xff] }
   0x5   :  { %v17_v6 = vsub.f32 %v333_v3, %v334_v4  ;;  %10 = vst [vmem:[#allocation0] sm:$0xff] %v8_v2  ;;  %v37_v11 = vsub.f32 %v337_v8, %v338_v9  ;;  %v339_v12 = vld [vmem:[%s633_s0 + $0x20] sm:$0xff]  ;;  %v343_v17 = vld [vmem:[%s633_s0 + $0x30] sm:$0xff]  ;;  %30 = vst [vmem:[#allocation0 + $0x10] sm:$0xff] %v27_v10  ;;  %v177_v55 = vsub.f32 %v365_v50, %v366_v52 }
   0x6   :  { %v340_v13 = vld [vmem:[%s634_s1 + $0x20] sm:$0xff]  ;;  %v344_v18 = vld [vmem:[%s634_s1 + $0x30] sm:$0xff]  ;;  %v367_v53 = vld [vmem:[%s633_s0 + $0x18] sm:$0xff]  ;;  %170 = vst [vmem:[#allocation0 + $0x8] sm:$0xff] %v167_v51 }
   0x7   :  { %v341_v14 = vld [vmem:[%s633_s0 + $0xa0] sm:$0xff]  ;;  %20 = vst [vmem:[#allocation0 + $0x80] sm:$0xff] %v17_v6  ;;  %v47_v15 = vsub.f32 %v339_v12, %v340_v13  ;;  %40 = vst [vmem:[#allocation0 + $0x90] sm:$0xff] %v37_v11  ;;  %v67_v20 = vsub.f32 %v343_v17, %v344_v18  ;;  %v345_v21 = vld [vmem:[%s633_s0 + $0xb0] sm:$0xff] }
   0x8   :  { %v342_v16 = vld [vmem:[%s634_s1 + $0xa0] sm:$0xff]  ;;  %v346_v22 = vld [vmem:[%s634_s1 + $0xb0] sm:$0xff]  ;;  %v368_v54 = vld [vmem:[%s634_s1 + $0x18] sm:$0xff]  ;;  %180 = vst [vmem:[#allocation0 + $0x88] sm:$0xff] %v177_v55 }
   0x9   :  { %v57_v19 = vsub.f32 %v341_v14, %v342_v16  ;;  %v347_v23 = vld [vmem:[%s633_s0 + $0x40] sm:$0xff]  ;;  %50 = vst [vmem:[#allocation0 + $0x20] sm:$0xff] %v47_v15  ;;  %v77_v24 = vsub.f32 %v345_v21, %v346_v22  ;;  %70 = vst [vmem:[#allocation0 + $0x30] sm:$0xff] %v67_v20  ;;  %v351_v30 = vld [vmem:[%s633_s0 + $0x50] sm:$0xff]  ;;  %v187_v56 = vsub.f32 %v367_v53, %v368_v54 }
   0xa   :  { %v348_v25 = vld [vmem:[%s634_s1 + $0x40] sm:$0xff]  ;;  %v352_v31 = vld [vmem:[%s634_s1 + $0x50] sm:$0xff]  ;;  %v369_v57 = vld [vmem:[%s633_s0 + $0x98] sm:$0xff] }
   0xb   :  { %v349_v26 = vld [vmem:[%s633_s0 + $0xc0] sm:$0xff]  ;;  %60 = vst [vmem:[#allocation0 + $0xa0] sm:$0xff] %v57_v19  ;;  %v87_v28 = vsub.f32 %v347_v23, %v348_v25  ;;  %v353_v32 = vld [vmem:[%s633_s0 + $0xd0] sm:$0xff]  ;;  %80 = vst [vmem:[#allocation0 + $0xb0] sm:$0xff] %v77_v24  ;;  %v107_v33 = vsub.f32 %v351_v30, %v352_v31 }
   0xc   :  { %v350_v27 = vld [vmem:[%s634_s1 + $0xc0] sm:$0xff]  ;;  %v354_v34 = vld [vmem:[%s634_s1 + $0xd0] sm:$0xff]  ;;  %v370_v58 = vld [vmem:[%s634_s1 + $0x98] sm:$0xff]  ;;  %190 = vst [vmem:[#allocation0 + $0x18] sm:$0xff] %v187_v56 }
   0xd   :  { %v97_v29 = vsub.f32 %v349_v26, %v350_v27  ;;  %v355_v35 = vld [vmem:[%s633_s0 + $0x60] sm:$0xff]  ;;  %90 = vst [vmem:[#allocation0 + $0x40] sm:$0xff] %v87_v28  ;;  %v117_v37 = vsub.f32 %v353_v32, %v354_v34  ;;  %v359_v41 = vld [vmem:[%s633_s0 + $0x70] sm:$0xff]  ;;  %110 = vst [vmem:[#allocation0 + $0x50] sm:$0xff] %v107_v33  ;;  %v197_v60 = vsub.f32 %v369_v57, %v370_v58 }
   0xe   :  { %v356_v36 = vld [vmem:[%s634_s1 + $0x60] sm:$0xff]  ;;  %v360_v43 = vld [vmem:[%s634_s1 + $0x70] sm:$0xff]  ;;  %v371_v59 = vld [vmem:[%s633_s0 + $0x28] sm:$0xff] }
   0xf   :  { %100 = vst [vmem:[#allocation0 + $0xc0] sm:$0xff] %v97_v29  ;;  %v127_v38 = vsub.f32 %v355_v35, %v356_v36  ;;  %v357_v39 = vld [vmem:[%s633_s0 + $0xe0] sm:$0xff]  ;;  %v361_v44 = vld [vmem:[%s633_s0 + $0xf0] sm:$0xff]  ;;  %120 = vst [vmem:[#allocation0 + $0xd0] sm:$0xff] %v117_v37  ;;  %v147_v46 = vsub.f32 %v359_v41, %v360_v43 }
  0x10   :  { %v358_v40 = vld [vmem:[%s634_s1 + $0xe0] sm:$0xff]  ;;  %v362_v45 = vld [vmem:[%s634_s1 + $0xf0] sm:$0xff]  ;;  %v372_v61 = vld [vmem:[%s634_s1 + $0x28] sm:$0xff]  ;;  %200 = vst [vmem:[#allocation0 + $0x98] sm:$0xff] %v197_v60 }
  0x11   :  { %v137_v42 = vsub.f32 %v357_v39, %v358_v40  ;;  %130 = vst [vmem:[#allocation0 + $0x60] sm:$0xff] %v127_v38  ;;  %v157_v47 = vsub.f32 %v361_v44, %v362_v45  ;;  %150 = vst [vmem:[#allocation0 + $0x70] sm:$0xff] %v147_v46  ;;  %v373_v62 = vld [vmem:[%s633_s0 + $0xa8] sm:$0xff]  ;;  %v207_v0 = vsub.f32 %v371_v59, %v372_v61  ;;  %v375_v2 = vld [vmem:[%s633_s0 + $0x38] sm:$0xff] }
  0x12   :  { %v374_v63 = vld [vmem:[%s634_s1 + $0xa8] sm:$0xff]  ;;  %v376_v3 = vld [vmem:[%s634_s1 + $0x38] sm:$0xff] }
  0x13   :  { %140 = vst [vmem:[#allocation0 + $0xe0] sm:$0xff] %v137_v42  ;;  %160 = vst [vmem:[#allocation0 + $0xf0] sm:$0xff] %v157_v47  ;;  %v217_v1 = vsub.f32 %v373_v62, %v374_v63  ;;  %v377_v4 = vld [vmem:[%s633_s0 + $0xb8] sm:$0xff]  ;;  %v227_v5 = vsub.f32 %v375_v2, %v376_v3  ;;  %v379_v7 = vld [vmem:[%s633_s0 + $0x48] sm:$0xff] }
  0x14   :  { %v378_v6 = vld [vmem:[%s634_s1 + $0xb8] sm:$0xff]  ;;  %v380_v8 = vld [vmem:[%s634_s1 + $0x48] sm:$0xff]  ;;  %210 = vst [vmem:[#allocation0 + $0x28] sm:$0xff] %v207_v0 }
  0x15   :  { %220 = vst [vmem:[#allocation0 + $0xa8] sm:$0xff] %v217_v1  ;;  %v237_v9 = vsub.f32 %v377_v4, %v378_v6  ;;  %v247_v10 = vsub.f32 %v379_v7, %v380_v8  ;;  %v381_v11 = vld [vmem:[%s633_s0 + $0xc8] sm:$0xff]  ;;  %v383_v13 = vld [vmem:[%s633_s0 + $0x58] sm:$0xff]  ;;  %230 = vst [vmem:[#allocation0 + $0x38] sm:$0xff] %v227_v5 }
  0x16   :  { %v382_v12 = vld [vmem:[%s634_s1 + $0xc8] sm:$0xff]  ;;  %v384_v15 = vld [vmem:[%s634_s1 + $0x58] sm:$0xff] }
  0x17   :  { %v257_v14 = vsub.f32 %v381_v11, %v382_v12  ;;  %v385_v16 = vld [vmem:[%s633_s0 + $0xd8] sm:$0xff]  ;;  %240 = vst [vmem:[#allocation0 + $0xb8] sm:$0xff] %v237_v9  ;;  %250 = vst [vmem:[#allocation0 + $0x48] sm:$0xff] %v247_v10  ;;  %v267_v18 = vsub.f32 %v383_v13, %v384_v15  ;;  %v387_v20 = vld [vmem:[%s633_s0 + $0x68] sm:$0xff] }
  0x18   :  { %v386_v17 = vld [vmem:[%s634_s1 + $0xd8] sm:$0xff]  ;;  %v388_v21 = vld [vmem:[%s634_s1 + $0x68] sm:$0xff] }
  0x19   :  { %v277_v19 = vsub.f32 %v385_v16, %v386_v17  ;;  %v389_v22 = vld [vmem:[%s633_s0 + $0xe8] sm:$0xff]  ;;  %260 = vst [vmem:[#allocation0 + $0xc8] sm:$0xff] %v257_v14  ;;  %v287_v23 = vsub.f32 %v387_v20, %v388_v21  ;;  %v391_v25 = vld [vmem:[%s633_s0 + $0x78] sm:$0xff]  ;;  %270 = vst [vmem:[#allocation0 + $0x58] sm:$0xff] %v267_v18 }
  0x1a   :  { %v390_v24 = vld [vmem:[%s634_s1 + $0xe8] sm:$0xff]  ;;  %v392_v26 = vld [vmem:[%s634_s1 + $0x78] sm:$0xff] }
  0x1b   :  { %280 = vst [vmem:[#allocation0 + $0xd8] sm:$0xff] %v277_v19  ;;  %v297_v27 = vsub.f32 %v389_v22, %v390_v24  ;;  %v307_v28 = vsub.f32 %v391_v25, %v392_v26  ;;  %v393_v29 = vld [vmem:[%s633_s0 + $0xf8] sm:$0xff]  ;;  %290 = vst [vmem:[#allocation0 + $0x68] sm:$0xff] %v287_v23 }
  0x1c   :  { %v394_v30 = vld [vmem:[%s634_s1 + $0xf8] sm:$0xff]  ;;  %s398_s1 = scalar_lea.vmem %s325_s16, 4096 }
  0x1d   :  { %v317_v31 = vsub.f32 %v393_v29, %v394_v30  ;;  %300 = vst [vmem:[#allocation0 + $0xe8] sm:$0xff] %v297_v27  ;;  %310 = vst [vmem:[#allocation0 + $0x78] sm:$0xff] %v307_v28  ;;  %p399_p0 = scmp.ne.s32.totalorder %s325_s16, %s398_s1  ;;  %p404_p2 = scmp.lt.s32.totalorder %s398_s1, %s398_s1 }
  0x1f   :  { %320 = vst [vmem:[#allocation0 + $0xf8] sm:$0xff] %v317_v31  ;;  %p405_p3 = por %p404_p2, %p403_p1 }
  0x21   :  { %p406_p4 = pnand %p405_p3, %p399_p0 }
  0x23   :  { %409 = shalt.err (!%p406_p4)
}
  0x24   :  { %s421_s26 = smov 256   ;;  %s422_s27 = smov 16  }
  0x25   :  { %330 = dma.vmem_to_hbm [thread:$0]  %s325_s16, 4096, %s635_s2, [#allocation1], %s421_s26, %s421_s26, %s422_s27  }
  0x26   :  { %418 = dma.done.wait [#allocation1], 4096  }
  0x27   :  { %419 = vsyncadd [#allocation1], 4294963200 }
  0x28   :  { %332 = vsyncpa [#allocation1], 1 }

// kernel: adapter_forward.1
= control target key start
LH: loop header
LB: loop body
LE: loop exit
PB: predicated region body
PF: predicated region fallthrough
CT: control target
= control target key end

     0   :  { %s1751_s0 = inlined_call_operand.hbm [shape: f32[128,256], index: 0, kind: input, shape index: {}]   ;;  %s1752_s1 = inlined_call_operand.hbm [shape: f32[128,256], index: 1, kind: input, shape index: {}]   ;;  %s1753_s2 = inlined_call_operand.vmem [shape: f32[1,256], index: 2, kind: input, shape index: {}]   ;;  %s1754_s3 = inlined_call_operand.vmem [shape: f32[1,256], index: 3, kind: input, shape index: {}]   ;;  %s1755_s4 = inlined_call_operand.hbm [shape: f32[256,128], index: 4, kind: input, shape index: {}]   ;;  %s1756_s5 = inlined_call_operand.vmem [shape: f32[1,128], index: 5, kind: input, shape index: {}]   ;;  %s1757_s6 = inlined_call_operand.hbm [shape: f32[128,256], index: 6, kind: input, shape index: {}]   ;;  %s1758_s7 = inlined_call_operand.vmem [shape: f32[1,256], index: 7, kind: input, shape index: {}]   ;;  %s1759_s8 = inlined_call_operand.vmem [shape: f32[128,256], index: 8, kind: output, shape index: {0}]   ;;  %s1760_s9 = inlined_call_operand.hbm [shape: f32[128,128], index: 9, kind: output, shape index: {1}]  }
   0x1   :  { %1771 = sst [smem:[#allocation19_spill]] %s1751_s0 }
   0x2   :  { %1772 = sst [smem:[#allocation20_spill]] %s1755_s4 }
   0x3   :  { %1773 = sst [smem:[#allocation21_spill]] %s1757_s6 }
   0x4   :  { %15 = vsyncpa [#allocation3], 0 }
   0x5   :  { %17 = vsyncpa [#allocation3 + $0x1], 0 }
   0x6   :  { %18 = vsyncpa [#allocation6], 0 }
   0x7   :  { %20 = vsyncpa [#allocation6 + $0x1], 0 }
   0x8   :  { %21 = vsyncpa [#allocation9], 0 }
   0x9   :  { %22 = vsyncpa [#allocation4], 0 }
   0xa   :  { %24 = vsyncpa [#allocation4 + $0x1], 0  ;;  %s1421_s30 = smov 0   ;;  %s1423_s10 = smov 0  }
   0xb   :  { %s1425_s11 = smov 0   ;;  %s1427_s12 = smov 0  }
   0xc LB: > { %1774 = sst [smem:[#allocation16_spill]] %s1353_s11  ;;  %s1442_s13 = sadd.s32 4294967295, %s1357_s12   ;;  %s1357_s12 = sphi %s1427_s12, %s1796_s12   ;;  %s1353_s11 = sphi %s1425_s11, %s1798_s11   ;;  %s1349_s10 = sphi %s1423_s10, %s1800_s10   ;;  %s1345_s30 = sphi %s1421_s30, %s1799_s30  }
   0xd   : > { %s1008_s14 = sadd.s32 4294967294, %s1357_s12   ;;  %p50_p0 = scmp.ne.s32.totalorder %s1349_s10, %s1345_s30 }
   0xe   : > { %p1761_p1 = scmp.eq.s32.totalorder %s1442_s13, 0  ;;  %p258_p3 = scmp.eq.s32.totalorder %s1008_s14, 3 }
   0xf   : > { %p1009_p5 = scmp.ge.s32.totalorder %s1357_s12, 1  ;;  %p265_p7 = scmp.lt.s32.totalorder %s1357_s12, 5 }
  0x10   : > { %p1451_p4 = por %p1761_p1, %p50_p0  ;;  %p1456_p6 = por %p258_p3, %p50_p0 }
  0x11   : > { %p1461_p8 = pnand %p1009_p5, %p265_p7  ;;  %s1359_s18 = smov [#allocation7]  }
  0x12   : > { %s1775_s15 = scalar_select %p1451_p4, 1, 0 }
  0x13   : > { %s1776_s16 = scalar_select %p1456_p6, 1, 0 }
  0x14   : > { %s283_s19 = sshll.u32 %s1359_s18, 4  ;;  %p1100_p9 = pneg %p1461_p8  ;;  %s284_s19 = int_to_ptr.vmem [resolvable:$true] %s283_s19 }
  0x15   : > { %s1360_s21 = smov [#allocation8]   ;;  %s1184_s23 = scalar_lea.vmem %s284_s19, 4096 }
  0x16   : > { %p1469_p10 = pnand %p1100_p9, %p1761_p1  ;;  %s299_s22 = sshll.u32 %s1360_s21, 4  ;;  %s300_s22 = int_to_ptr.vmem [resolvable:$true] %s299_s22 }
  0x17   : > { %p1185_p12 = scmp.ne.s32.totalorder %s284_s19, %s1184_s23  ;;  %p1192_p3 = scmp.lt.s32.totalorder %s284_s19, %s284_s19 }
  0x18   : > { %p1175_p11 = pneg %p1469_p10  ;;  %p1193_p5 = scmp.lt.s32.totalorder %s1184_s23, %s1184_s23 }
  0x1a   : > { %p1187_p13 = pnand %p1185_p12, %p1175_p11  ;;  %p1194_p7 = por %p1193_p5, %p1192_p3 }
  0x1c   : > { %p1188_p0 = pneg %p1187_p13 }
  0x1e   : > { %p1195_p9 = pnand %p1194_p7, %p1188_p0 }
  0x20   : > { %1198 = shalt.err (!%p1195_p9)
}
  0x21   : > { %s1361_s24 = smov 128   ;;  %s1362_s25 = smov 8  }
  0x22   : > { %s1779_s4 = sld [smem:[#allocation20_spill]]  ;;  %s1210_s28 = scalar_lea.vmem %s300_s22, 4096 }
  0x23   : > { %p1211_p1 = scmp.ne.s32.totalorder %s300_s22, %s1210_s28  ;;  %p1218_p2 = scmp.lt.s32.totalorder %s300_s22, %s300_s22 }
  0x24   : > { %p1219_p6 = scmp.lt.s32.totalorder %s1210_s28, %s1210_s28 }
  0x25   : > { %p1213_p12 = pnand %p1211_p1, %p1175_p11 }
  0x26   : > { %p1220_p3 = por %p1219_p6, %p1218_p2 }
  0x27   : > { %p1214_p13 = pneg %p1213_p12 }
  0x28   : > { %1103 = dma.hbm_to_vmem [thread:$0]  (!%p1469_p10), %s1779_s4, 4096, %s284_s19, [#allocation6], %s1361_s24, %s1361_s24, %s1362_s25  }
  0x29   : > { %p1221_p0 = pnand %p1220_p3, %p1214_p13 }
  0x2b   : > { %1224 = shalt.err (!%p1221_p0)
}
  0x2c   : > { %s1762_s29 = smov 256   ;;  %s1764_s14 = smov 16  }
  0x2d   : > { %s1780_s6 = sld [smem:[#allocation21_spill]]  ;;  %s1495_s21 = sadd.s32 1, %s1357_s12  }
  0x2e   : > { %1781 = sst [smem:[#allocation17_spill]] %s1495_s21  ;;  %s34_s23 = ssub.s32 %s1357_s12, %s1495_s21 }
  0x2f   : > { %p35_p1 = scmp.eq.s32.totalorder %s34_s23, 0  ;;  %s37_s24 = sadd.s32 1, %s1353_s11 }
  0x30   : > { %p44_p2 = scmp.ne.s32.totalorder %s1353_s11, %s1349_s10  ;;  %p45_p6 = scmp.eq.s32.totalorder %s1357_s12, 0 }
  0x31   : > { %s1504_s25 = scalar_select %p35_p1, %s1353_s11, %s37_s24  }
  0x32   : > { %p46_p11 = por %p45_p6, %p44_p2  ;;  %p1783_p5 = scmp.eq.s32.totalorder %s1442_s13, 3 }
  0x33   : > { %1106 = dma.hbm_to_vmem [thread:$0]  (!%p1469_p10), %s1780_s6, 4096, %s300_s22, [#allocation9], %s1762_s29, %s1762_s29, %s1764_s14  }
  0x34   : > { %1782 = sst [smem:[#allocation18_spill]] %s1504_s25  ;;  %p1508_p7 = por %p1783_p5, %p44_p2 }
  0x35   : > { %p1120_p9 = scmp.lt.s32.totalorder %s1357_s12, 4  ;;  %s316_s26 = sand.u32 1, %s1353_s11  }
  0x36   : > { %s1784_s20 = scalar_select %p1508_p7, 1, 0 }
  0x37   : > { %s1013_s27 = sshll.u32 %s316_s26, 6  ;;  %s1037_s22 = sshll.u32 %s1357_s12, 10 }
  0x38   : > { %s1785_s0 = sld [smem:[#allocation19_spill]]  ;;  %s320_s23 = scalar_lea.vmem [#allocation2], %s1013_s27 }
  0x39   : > { %s328_s24 = sshll.u32 %s320_s23, 4  ;;  %p1522_p10 = pnand %p1120_p9, %p46_p11  ;;  %s1520_s24 = int_to_ptr.vmem [resolvable:$true] %s328_s24 }
  0x3a   : > { %s1529_s6 = scalar_lea.hbm %s1752_s1, %s1037_s22  ;;  %s342_s28 = scalar_lea.vmem [#allocation5], %s1013_s27 }
  0x3b   : > { %s1531_s18 = sshll.u32 %s342_s28, 4  ;;  %s1533_s25 = scalar_lea.sflag [#allocation3], %s316_s26  ;;  %s1564_s18 = int_to_ptr.vmem [resolvable:$true] %s1531_s18 }
  0x3c   : > { %p1227_p13 = pneg %p1522_p10 }
  0x3e   : > { %s1518_s19 = scalar_lea.hbm %s1785_s0, %s1037_s22  ;;  %s1230_s4 = scalar_lea.hbm %s1785_s0, 4096 }
  0x3f   : > { %s1225_s11 = scalar_lea.hbm %s1518_s19, 1024  ;;  %p1231_p1 = scmp.lt.s32.totalorder %s1518_s19, %s1785_s0 }
  0x40   : > { %p1226_p12 = scmp.ne.s32.totalorder %s1518_s19, %s1225_s11  ;;  %p1232_p2 = scmp.lt.s32.totalorder %s1230_s4, %s1225_s11 }
  0x42   : > { %p1228_p3 = pnand %p1227_p13, %p1226_p12  ;;  %p1233_p6 = por %p1232_p2, %p1231_p1 }
  0x44   : > { %p1229_p0 = pneg %p1228_p3 }
  0x46   : > { %p1234_p11 = pnand %p1233_p6, %p1229_p0 }
  0x48   : > { %1237 = shalt.err (!%p1234_p11)
}
  0x49   : > { %s1238_s26 = scalar_lea.vmem %s1520_s24, 1024  ;;  %s1365_s21 = smov [#allocation2]  }
  0x4a   : > { %p1239_p5 = scmp.ne.s32.totalorder %s1520_s24, %s1238_s26  ;;  %s1243_s27 = sshll.u32 %s1365_s21, 4  ;;  %s1244_s27 = int_to_ptr.vmem [resolvable:$false] %s1243_s27 }
  0x4b   : > { %s1245_s28 = scalar_lea.vmem %s1244_s27, 2048  ;;  %p1246_p3 = scmp.lt.s32.totalorder %s1520_s24, %s1244_s27 }
  0x4c   : > { %p1241_p9 = pnand %p1239_p5, %p1227_p13  ;;  %p1247_p7 = scmp.lt.s32.totalorder %s1245_s28, %s1238_s26 }
  0x4e   : > { %p1242_p12 = pneg %p1241_p9  ;;  %p1248_p4 = por %p1247_p7, %p1246_p3 }
  0x50   : > { %p1249_p1 = pnand %p1248_p4, %p1242_p12 }
  0x52   : > { %1252 = shalt.err (!%p1249_p1)
}
  0x53   : > { %s1787_s11 = smov 16   ;;  %s1788_s23 = smov 256  }
  0x54   : > { %1110 = dma.hbm_to_vmem [thread:$0]  (!%p1522_p10), %s1518_s19, 1024, %s1520_s24, %s1533_s25, %s1788_s23, %s1788_s23, %s1787_s11  }
  0x55   : > { %s338_s4 = sand.u32 1, %s1357_s12   ;;  %s1253_s22 = scalar_lea.hbm %s1529_s6, 1024 }
  0x56   : > { %s339_s14 = scalar_lea.sflag [#allocation6], %s338_s4  ;;  %p1254_p4 = scmp.ne.s32.totalorder %s1529_s6, %s1253_s22 }
  0x57   : > { %s1258_s27 = scalar_lea.hbm %s1752_s1, 4096  ;;  %p1259_p2 = scmp.lt.s32.totalorder %s1529_s6, %s1752_s1 }
  0x58   : > { %p1256_p7 = pnand %p1254_p4, %p1227_p13  ;;  %p1260_p6 = scmp.lt.s32.totalorder %s1258_s27, %s1253_s22 }
  0x5a   : > { %p1257_p0 = pneg %p1256_p7  ;;  %p1261_p11 = por %p1260_p6, %p1259_p2 }
  0x5c   : > { %p1262_p5 = pnand %p1261_p11, %p1257_p0 }
  0x5e   : > { %1265 = shalt.err (!%p1262_p5)
}
  0x5f   : > { %s1266_s25 = scalar_lea.vmem %s1564_s18, 1024  ;;  %s1366_s19 = smov [#allocation5]  }
  0x60   : > { %p1267_p9 = scmp.ne.s32.totalorder %s1564_s18, %s1266_s25  ;;  %s1271_s24 = sshll.u32 %s1366_s19, 4  ;;  %s1272_s24 = int_to_ptr.vmem [resolvable:$false] %s1271_s24 }
  0x61   : > { %s1273_s4 = scalar_lea.vmem %s1272_s24, 2048  ;;  %p1274_p1 = scmp.lt.s32.totalorder %s1564_s18, %s1272_s24 }
  0x62   : > { %p1269_p12 = pnand %p1267_p9, %p1227_p13  ;;  %p1275_p4 = scmp.lt.s32.totalorder %s1273_s4, %s1266_s25 }
  0x64   : > { %p1270_p3 = pneg %p1269_p12  ;;  %p1276_p7 = por %p1275_p4, %p1274_p1 }
  0x66   : > { %p1277_p2 = pnand %p1276_p7, %p1270_p3 }
  0x68   : > { %1280 = shalt.err (!%p1277_p2)
}
  0x69   : > { %1113 = dma.hbm_to_vmem [thread:$0]  (!%p1522_p10), %s1529_s6, 1024, %s1564_s18, %s339_s14, %s1788_s23, %s1788_s23, %s1787_s11  }
  0x6a   : > { %362 = sbr.rel (%p1461_p8) target bundleno = 846 (0x34e), region = 52  ;;  %s1595_s0 = sand.u32 (!%p1461_p8), 1, %s1349_s10  }
  0x6b   : > { %s1022_s22 = sshll.u32 (!%p1461_p8), %s1595_s0, 6  ;;  %s365_s26 = scalar_lea.sflag (!%p1461_p8), [#allocation3], %s1595_s0 }
  0x6c   : > { %s368_s21 = scalar_lea.vmem (!%p1461_p8), [#allocation2], %s1022_s22  ;;  %p1789_p13 = scmp.ne.s32.totalorder (!%p1461_p8), %s1775_s15, 0 }
  0x6f   : > { %1324 = dma.done.wait (%p1789_p13), %s365_s26, 1024  }
  0x70   : > { %1326 = vsyncadd (%p1789_p13), %s365_s26, 4294966272  ;;  %s373_s6 = sand.u32 1, %s1442_s13   ;;  %s1604_s17 = scalar_lea.vmem [#allocation5], %s1022_s22 }
  0x71   : > { %s374_s29 = scalar_lea.sflag [#allocation6], %s373_s6 }
  0x72   : > { %1328 = dma.done.wait (%p1789_p13), %s374_s29, 1024  }
  0x73   : > { %1330 = vsyncadd (%p1789_p13), %s374_s29, 4294966272  ;;  %p1790_p8 = scmp.eq.s32.totalorder %s1442_s13, 0 }
  0x75   : > { %1332 = dma.done.wait (%p1790_p8), [#allocation6], 4096   ;;  %p1791_p10 = pmov %p1790_p8 }
  0x76   : > { %p1792_p0 = pmov %p1790_p8 }
  0x77   : > { %1334 = vsyncadd (%p1791_p10), [#allocation6], 4294963200 }
  0x78   : > { %1336 = dma.done.wait (%p1792_p0), [#allocation9], 4096   ;;  %p1793_p6 = pmov %p1792_p0 }
  0x79   : > { %v441_v0 = vld [vmem:[%s368_s21] sm:$0xff]  ;;  %v442_v1 = vld [vmem:[%s368_s21 + $0x8] sm:$0xff]  ;;  %v443_v5 = vld [vmem:[%s368_s21 + $0x10] sm:$0xff]  ;;  %s1026_s28 = sshll.u32 %s1595_s0, 5  ;;  %s1041_s24 = sshll.u32 %s1442_s13, 9 }
  0x7a   : > { %1338 = vsyncadd (%p1793_p6), [#allocation9], 4294963200  ;;  %v445_v2 = vld [vmem:[%s368_s21 + $0x20] sm:$0xff]  ;;  %v449_v3 = vadd.f32 %v442_v1, %v441_v0  ;;  %v446_v4 = vld [vmem:[%s368_s21 + $0x28] sm:$0xff]  ;;  %s430_s25 = scalar_lea.vmem [#allocation10], %s1026_s28  ;;  %s1682_s26 = scalar_lea.hbm %s1760_s9, %s1041_s24 }
  0x7b   : > { %v444_v6 = vld [vmem:[%s368_s21 + $0x18] sm:$0xff]  ;;  %v455_v7 = vadd.f32 %v446_v4, %v445_v2  ;;  %v447_v8 = vld [vmem:[%s368_s21 + $0x30] sm:$0xff]  ;;  %v583_v16 = vld [vmem:[#allocation7 + $0xe8] sm:$0xff]  ;;  %s867_s19 = sshll.u32 %s430_s25, 4  ;;  %p1794_p5 = scmp.ne.s32.totalorder %s1784_s20, 0  ;;  %s1676_s19 = int_to_ptr.vmem [resolvable:$true] %s867_s19 }
  0x7c   : > { %v448_v9 = vld [vmem:[%s368_s21 + $0x38] sm:$0xff]  ;;  %450 = vadd.xlane.f32.xlu0 %v449_v3  ;;  %v452_v10 = vadd.f32 %v444_v6, %v443_v5  ;;  %v584_v14 = vld [vmem:[#allocation7 + $0xf0] sm:$0xff]  ;;  %v567_v17 = vld [vmem:[#allocation7 + $0x68] sm:$0xff]  ;;  %s850_s21 = scalar_lea.sflag [#allocation4], %s1595_s0  ;;  %s1281_s6 = scalar_lea.vmem %s1676_s19, 512 }
  0x7d   : > { %456 = vadd.xlane.f32.xlu1 %v455_v7  ;;  %v458_v11 = vadd.f32 %v448_v9, %v447_v8  ;;  %v585_v12 = vld [vmem:[#allocation7 + $0xf8] sm:$0xff]  ;;  %v568_v15 = vld [vmem:[#allocation7 + $0x70] sm:$0xff]  ;;  %v582_v18 = vld [vmem:[#allocation7 + $0xe0] sm:$0xff]  ;;  %p1282_p11 = scmp.ne.s32.totalorder %s1676_s19, %s1281_s6  ;;  %s1368_s29 = smov [#allocation10]  }
  0x7e   : > { %v569_v13 = vld [vmem:[#allocation7 + $0x78] sm:$0xff]  ;;  %1042 = vmatprep.subr.mxu0 %v585_v12  ;;  %v566_v47 = vld [vmem:[#allocation7 + $0x60] sm:$0xff]  ;;  %v580_v50 = vld [vmem:[#allocation7 + $0xd0] sm:$0xff]  ;;  %s1285_s15 = sshll.u32 %s1368_s29, 4  ;;  %s1286_s15 = int_to_ptr.vmem [resolvable:$false] %s1285_s15 }
  0x7f   : > { %1043 = vmatpush3.msra.mxu0 %v569_v13  ;;  %v581_v48 = vld [vmem:[#allocation7 + $0xd8] sm:$0xff]  ;;  %v564_v51 = vld [vmem:[#allocation7 + $0x50] sm:$0xff]  ;;  %v579_v52 = vld [vmem:[#allocation7 + $0xc8] sm:$0xff]  ;;  %p1283_p9 = pnand %p1282_p11, %p1794_p5  ;;  %s1287_s18 = scalar_lea.vmem %s1286_s15, 1024 }
  0x80   : > { %453 = vadd.xlane.f32.xlu0 %v452_v10  ;;  %1044 = vmatprep.subr.mxu0 %v584_v14  ;;  %v565_v49 = vld [vmem:[#allocation7 + $0x58] sm:$0xff]  ;;  %v563_v53 = vld [vmem:[#allocation7 + $0x48] sm:$0xff]  ;;  %v578_v54 = vld [vmem:[#allocation7 + $0xc0] sm:$0xff]  ;;  %p1288_p3 = scmp.lt.s32.totalorder %s1676_s19, %s1286_s15  ;;  %p1289_p1 = scmp.lt.s32.totalorder %s1287_s18, %s1281_s6 }
  0x81   : > { %459 = vadd.xlane.f32.xlu1 %v458_v11  ;;  %1045 = vmatpush3.msra.mxu0 %v568_v15  ;;  %v562_v55 = vld [vmem:[#allocation7 + $0x40] sm:$0xff]  ;;  %v577_v56 = vld [vmem:[#allocation7 + $0xb8] sm:$0xff]  ;;  %v576_v58 = vld [vmem:[#allocation7 + $0xb0] sm:$0xff]  ;;  %p1284_p12 = pneg %p1283_p9 }
  0x82   : > { %1046 = vmatprep.subr.mxu0 %v583_v16  ;;  %v561_v57 = vld [vmem:[#allocation7 + $0x38] sm:$0xff]  ;;  %v560_v59 = vld [vmem:[#allocation7 + $0x30] sm:$0xff]  ;;  %v575_v60 = vld [vmem:[#allocation7 + $0xa8] sm:$0xff]  ;;  %p1290_p4 = por %p1289_p1, %p1288_p3 }
  0x83   : > { %1047 = vmatpush3.msra.mxu0 %v567_v17  ;;  %v559_v61 = vld [vmem:[#allocation7 + $0x28] sm:$0xff]  ;;  %v574_v62 = vld [vmem:[#allocation7 + $0xa0] sm:$0xff]  ;;  %v556_v3 = vld [vmem:[#allocation7 + $0x10] sm:$0xff] }
  0x84   : > { %1048 = vmatprep.subr.mxu0 %v582_v18  ;;  %v558_v63 = vld [vmem:[#allocation7 + $0x20] sm:$0xff]  ;;  %v711_v10 = vld [vmem:[#allocation8 + $0xe8] sm:$0xff]  ;;  %v709_v12 = vld [vmem:[#allocation8 + $0xd8] sm:$0xff]  ;;  %p1291_p7 = pnand %p1290_p4, %p1284_p12 }
  0x85   : > { %1049 = vmatpush3.msra.mxu0 %v566_v47  ;;  %v554_v7 = vld [vmem:[#allocation7] sm:$0xff]  ;;  %v708_v13 = vld [vmem:[#allocation8 + $0xd0] sm:$0xff]  ;;  %v707_v14 = vld [vmem:[#allocation8 + $0xc8] sm:$0xff] }
  0x86   : > { %1050 = vmatprep.subr.mxu0 %v581_v48  ;;  %v710_v11 = vld [vmem:[#allocation8 + $0xe0] sm:$0xff]  ;;  %v705_v16 = vld [vmem:[#allocation8 + $0xb8] sm:$0xff]  ;;  %v704_v17 = vld [vmem:[#allocation8 + $0xb0] sm:$0xff] }
  0x87   : > { %1051 = vmatpush3.msra.mxu0 %v565_v49  ;;  %v706_v15 = vld [vmem:[#allocation8 + $0xc0] sm:$0xff]  ;;  %v703_v18 = vld [vmem:[#allocation8 + $0xa8] sm:$0xff] }
  0x88   : > { %1052 = vmatprep.subr.mxu0 %v580_v50 }
  0x89   : > { %1053 = vmatpush3.msra.mxu0 %v564_v51 }
  0x8a   : > { %1054 = vmatprep.subr.mxu0 %v579_v52 }
  0x8b   : > { %1055 = vmatpush3.msra.mxu0 %v563_v53 }
  0x8c   : > { %1056 = vmatprep.subr.mxu0 %v578_v54 }
  0x8d   : > { %1057 = vmatpush3.msra.mxu0 %v562_v55  ;;  %v514_v55 = vld [vmem:[%s1753_s2] sm:$0x3] }
  0x8e   : > { %1058 = vmatprep.subr.mxu0 %v577_v56  ;;  %v534_v56 = vld [vmem:[%s1754_s3] sm:$0x3] }
  0x8f   : > { %1059 = vmatpush3.msra.mxu0 %v561_v57 }
  0x90   : > { %1060 = vmatprep.subr.mxu0 %v576_v58 }
  0x91   : > { %1061 = vmatpush3.msra.mxu0 %v560_v59 }
  0x92   : > { %1062 = vmatprep.subr.mxu0 %v575_v60 }
  0x93   : > { %1063 = vmatpush3.msra.mxu0 %v559_v61 }
  0x94   : > { %1064 = vmatprep.subr.mxu0 %v574_v62 }
  0x95   : > { %1065 = vmatpush3.msra.mxu0 %v558_v63 }
 0x105   : > { %v451_v19 = vpop.xlane.xlu0 %450 }
 0x106   : > { %v462_v20 = vmul.f32 0.00390625, %v451_v19  ;;  %v457_v21 = vpop.xlane.xlu1 %456  ;;  %v702_v19 = vld [vmem:[#allocation8 + $0xa0] sm:$0xff] }
 0x107   : > { %v464_v22 = vmul.f32 0.00390625, %v457_v21  ;;  %v700_v21 = vld [vmem:[#allocation8 + $0x90] sm:$0xff] }
 0x108   : > { %v1618_v23 = vsub.f32 %v441_v0, %v462_v20  ;;  %v1620_v24 = vsub.f32 %v442_v1, %v462_v20  ;;  %v573_v0 = vld [vmem:[#allocation7 + $0x98] sm:$0xff] }
 0x109   : > { %v1622_v25 = vsub.f32 %v445_v2, %v464_v22  ;;  %v1624_v26 = vsub.f32 %v446_v4, %v464_v22  ;;  %v454_v27 = vpop.xlane.xlu0 %453  ;;  %v557_v1 = vld [vmem:[#allocation7 + $0x18] sm:$0xff]  ;;  %v572_v2 = vld [vmem:[#allocation7 + $0x90] sm:$0xff]  ;;  %1066 = vmatprep.subr.mxu0 %v573_v0  ;;  %v571_v4 = vld [vmem:[#allocation7 + $0x88] sm:$0xff] }
 0x10a   : > { %v463_v28 = vmul.f32 0.00390625, %v454_v27  ;;  %v460_v29 = vpop.xlane.xlu1 %459  ;;  %v474_v30 = vmul.f32 %v1618_v23, %v1618_v23  ;;  %v475_v31 = vmul.f32 %v1620_v24, %v1620_v24  ;;  %1067 = vmatpush3.msra.mxu0 %v557_v1  ;;  %v701_v20 = vld [vmem:[#allocation8 + $0x98] sm:$0xff]  ;;  %v699_v22 = vld [vmem:[#allocation8 + $0x88] sm:$0xff]  ;;  %v698_v27 = vld [vmem:[#allocation8 + $0x80] sm:$0xff] }
 0x10b   : > { %v465_v32 = vmul.f32 0.00390625, %v460_v29  ;;  %v478_v33 = vmul.f32 %v1622_v25, %v1622_v25  ;;  %v479_v34 = vmul.f32 %v1624_v26, %v1624_v26  ;;  %1068 = vmatprep.subr.mxu0 %v572_v2  ;;  %v696_v29 = vld [vmem:[#allocation8 + $0x70] sm:$0xff] }
 0x10c   : > { %v1634_v35 = vsub.f32 %v443_v5, %v463_v28  ;;  %v1636_v36 = vsub.f32 %v444_v6, %v463_v28  ;;  %v482_v37 = vadd.f32 %v475_v31, %v474_v30  ;;  %v555_v5 = vld [vmem:[#allocation7 + $0x8] sm:$0xff]  ;;  %1069 = vmatpush3.msra.mxu0 %v556_v3  ;;  %v570_v6 = vld [vmem:[#allocation7 + $0x80] sm:$0xff]  ;;  %v697_v28 = vld [vmem:[#allocation8 + $0x78] sm:$0xff] }
 0x10d   : > { %v1638_v38 = vsub.f32 %v447_v8, %v465_v32  ;;  %v1640_v39 = vsub.f32 %v448_v9, %v465_v32  ;;  %v488_v40 = vadd.f32 %v479_v34, %v478_v33  ;;  %1070 = vmatprep.subr.mxu0 %v571_v4  ;;  %v713_v8 = vld [vmem:[#allocation8 + $0xf8] sm:$0xff]  ;;  %v712_v9 = vld [vmem:[#allocation8 + $0xf0] sm:$0xff]  ;;  %v695_v30 = vld [vmem:[#allocation8 + $0x68] sm:$0xff] }
 0x10e   : > { %483 = vadd.xlane.f32.xlu0 %v482_v37  ;;  %v476_v41 = vmul.f32 %v1634_v35, %v1634_v35  ;;  %v477_v42 = vmul.f32 %v1636_v36, %v1636_v36  ;;  %1071 = vmatpush3.msra.mxu0 %v555_v5  ;;  %v694_v31 = vld [vmem:[#allocation8 + $0x60] sm:$0xff]  ;;  %v693_v32 = vld [vmem:[#allocation8 + $0x58] sm:$0xff]  ;;  %v692_v33 = vld [vmem:[#allocation8 + $0x50] sm:$0xff] }
 0x10f   : > { %v480_v43 = vmul.f32 %v1638_v38, %v1638_v38  ;;  %v481_v44 = vmul.f32 %v1640_v39, %v1640_v39  ;;  %1072 = vmatprep.subr.mxu0 %v570_v6  ;;  %726 = vmatprep.subr.mxu1 %v713_v8  ;;  %v691_v34 = vld [vmem:[#allocation8 + $0x48] sm:$0xff] }
 0x110   : > { %v485_v45 = vadd.f32 %v477_v42, %v476_v41  ;;  %1073 = vmatpush3.msra.mxu0 %v554_v7  ;;  %727 = vmatpush1.msra.mxu1 %v712_v9 }
 0x111   : > { %v491_v46 = vadd.f32 %v481_v44, %v480_v43  ;;  %728 = vmatprep.subr.mxu1 %v711_v10 }
 0x112   : > { %489 = vadd.xlane.f32.xlu0 %v488_v40  ;;  %486 = vadd.xlane.f32.xlu1 %v485_v45 }
 0x113   : > { %729 = vmatpush1.msra.mxu1 %v710_v11 }
 0x114   : > { %730 = vmatprep.subr.mxu1 %v709_v12 }
 0x115   : > { %731 = vmatpush1.msra.mxu1 %v708_v13 }
 0x116   : > { %492 = vadd.xlane.f32.xlu1 %v491_v46  ;;  %732 = vmatprep.subr.mxu1 %v707_v14  ;;  %v516_v46 = vlaneseq }
 0x117   : > { %733 = vmatpush1.msra.mxu1 %v706_v15 }
 0x118   : > { %734 = vmatprep.subr.mxu1 %v705_v16  ;;  %v517_v51 = vshrl.u32 %v516_v46, 7 }
 0x119   : > { %735 = vmatpush1.msra.mxu1 %v704_v17 }
 0x11a   : > { %736 = vmatprep.subr.mxu1 %v703_v18  ;;  %v1650_v53 = vsub.s32 0, %v517_v51  ;;  %v1652_v54 = vsub.s32 1, %v517_v51 }
 0x11b   : > { %737 = vmatpush1.msra.mxu1 %v702_v19  ;;  %v690_v19 = vld [vmem:[#allocation8 + $0x40] sm:$0xff] }
 0x11c   : > { %738 = vmatprep.subr.mxu1 %v701_v20  ;;  %v519_v57 = vrot.slane %v514_v55, %v1650_v53  ;;  %v523_v58 = vrot.slane %v514_v55, %v1652_v54  ;;  %v539_v61 = vrot.slane %v534_v56, %v1650_v53  ;;  %v543_v62 = vrot.slane %v534_v56, %v1652_v54  ;;  %v689_v20 = vld [vmem:[#allocation8 + $0x38] sm:$0xff] }
 0x11d   : > { %739 = vmatpush1.msra.mxu1 %v700_v21  ;;  %v687_v21 = vld [vmem:[#allocation8 + $0x28] sm:$0xff] }
 0x11e   : > { %740 = vmatprep.subr.mxu1 %v699_v22  ;;  %v685_v22 = vld [vmem:[#allocation8 + $0x18] sm:$0xff] }
 0x11f   : > { %741 = vmatpush1.msra.mxu1 %v698_v27  ;;  %v684_v27 = vld [vmem:[#allocation8 + $0x10] sm:$0xff] }
 0x120   : > { %742 = vmatprep.subr.mxu1 %v697_v28  ;;  %v683_v28 = vld [vmem:[#allocation8 + $0x8] sm:$0xff] }
 0x121   : > { %743 = vmatpush1.msra.mxu1 %v696_v29  ;;  %v682_v29 = vld [vmem:[#allocation8] sm:$0xff] }
 0x122   : > { %744 = vmatprep.subr.mxu1 %v695_v30  ;;  %v1367_v30 = vmov 0.0  }
 0x123   : > { %745 = vmatpush1.msra.mxu1 %v694_v31  ;;  %790 = vmatprep.mubr.f32.mxu1 %v1367_v30 }
 0x124   : > { %746 = vmatprep.subr.mxu1 %v693_v32  ;;  %v1030_v32 = vld [vmem:[%s1756_s5] ss:$0 sm:$0xff] }
 0x125   : > { %747 = vmatpush1.msra.mxu1 %v692_v33 }
 0x126   : > { %748 = vmatprep.subr.mxu1 %v691_v34 }
 0x127   : > { %749 = vmatpush1.msra.mxu1 %v690_v19 }
 0x128   : > { %750 = vmatprep.subr.mxu1 %v689_v20 }
 0x197   : > { %v484_v37 = vpop.xlane.xlu0 %483 }
 0x198   : > { %v494_v40 = vmul.f32 0.00390625, %v484_v37 }
 0x19a   : > { %v498_v41 = vadd.f32 1e-05, %v494_v40 }
 0x19b   : > { %v487_v42 = vpop.xlane.xlu1 %486  ;;  %v490_v43 = vpop.xlane.xlu0 %489 }
 0x19c   : > { %1165 = vrsqrt.f32 %v498_v41  ;;  %v495_v44 = vmul.f32 0.00390625, %v487_v42  ;;  %v496_v45 = vmul.f32 0.00390625, %v490_v43 }
 0x19e   : > { %v499_v47 = vadd.f32 1e-05, %v495_v44  ;;  %v500_v48 = vadd.f32 1e-05, %v496_v45 }
 0x19f   : > { %v493_v49 = vpop.xlane.xlu1 %492 }
 0x1a0   : > { %1167 = vrsqrt.f32 %v499_v47  ;;  %v497_v50 = vmul.f32 0.00390625, %v493_v49 }
 0x1a1   : > { %1169 = vrsqrt.f32 %v500_v48 }
 0x1a2   : > { %v501_v52 = vadd.f32 1e-05, %v497_v50 }
 0x1a4   : > { %1171 = vrsqrt.f32 %v501_v52 }
 0x1a9   : > { %v1166_v59 = vpop.eup %1165 }
 0x1aa   : > { %v507_v60 = vmul.f32 %v1166_v59, %v1620_v24  ;;  %v506_v63 = vmul.f32 %v1166_v59, %v1618_v23 }
 0x1ac   : > { %v527_v0 = vmul.f32 %v523_v58, %v507_v60  ;;  %v526_v1 = vmul.f32 %v519_v57, %v506_v63 }
 0x1ad   : > { %v1168_v2 = vpop.eup %1167 }
 0x1ae   : > { %v1170_v3 = vpop.eup %1169  ;;  %v547_v4 = vadd.f32 %v543_v62, %v527_v0  ;;  %v546_v5 = vadd.f32 %v539_v61, %v526_v1  ;;  %v509_v6 = vmul.f32 %v1168_v2, %v1636_v36  ;;  %v508_v7 = vmul.f32 %v1168_v2, %v1634_v35 }
 0x1af   : > { %v511_v8 = vmul.f32 %v1170_v3, %v1624_v26  ;;  %v510_v24 = vmul.f32 %v1170_v3, %v1622_v25 }
 0x1b0   : > { %657 = vmatprep.mubr.f32.mxu0 %v547_v4  ;;  %v529_v9 = vmul.f32 %v523_v58, %v509_v6  ;;  %v528_v10 = vmul.f32 %v519_v57, %v508_v7 }
 0x1b1   : > { %v1172_v11 = vpop.eup %1171  ;;  %658 = vmatmul.mubr.f32.vlgmr.msra.gmra.mxu0 %v546_v5  ;;  %v531_v23 = vmul.f32 %v523_v58, %v511_v8  ;;  %v530_v15 = vmul.f32 %v519_v57, %v510_v24 }
 0x1b2   : > { %v549_v12 = vadd.f32 %v543_v62, %v529_v9  ;;  %v548_v13 = vadd.f32 %v539_v61, %v528_v10  ;;  %v513_v14 = vmul.f32 %v1172_v11, %v1640_v39  ;;  %v512_v16 = vmul.f32 %v1172_v11, %v1638_v38  ;;  %v688_v39 = vld [vmem:[#allocation8 + $0x30] sm:$0xff]  ;;  %v686_v38 = vld [vmem:[#allocation8 + $0x20] sm:$0xff] }
 0x1b3   : > { %v551_v36 = vadd.f32 %v543_v62, %v531_v23  ;;  %v550_v26 = vadd.f32 %v539_v61, %v530_v15  ;;  %751 = vmatpush1.msra.mxu1 %v688_v39 }
 0x1b4   : > { %662 = vmatprep.mubr.f32.mxu0 %v549_v12  ;;  %v533_v35 = vmul.f32 %v523_v58, %v513_v14  ;;  %v532_v25 = vmul.f32 %v519_v57, %v512_v16  ;;  %752 = vmatprep.subr.mxu1 %v687_v21 }
 0x1b5   : > { %663 = vmatmul.mubr.f32.gmra.mxu0 %v548_v13  ;;  %753 = vmatpush1.msra.mxu1 %v686_v38 }
 0x1b6   : > { %667 = vmatprep.mubr.f32.mxu0 %v551_v36  ;;  %v553_v17 = vadd.f32 %v543_v62, %v533_v35  ;;  %v552_v18 = vadd.f32 %v539_v61, %v532_v25  ;;  %754 = vmatprep.subr.mxu1 %v685_v22 }
 0x1b7   : > { %755 = vmatpush1.msra.mxu1 %v684_v27 }
 0x1b8   : > { %756 = vmatprep.subr.mxu1 %v683_v28 }
 0x1b9   : > { %668 = vmatmul.mubr.f32.gmra.mxu0 %v550_v26  ;;  %757 = vmatpush1.msra.mxu1 %v682_v29 }
 0x1ba   : > { %672 = vmatprep.mubr.f32.mxu0 %v553_v17 }
 0x1bd   : > { %673 = vmatmul.mubr.f32.gmra.mxu0 %v552_v18 }
 0x271   : > { %v1074_v31 = vpop.f32.mrf.mxu0 }
 0x273   : > { %v1075_v33 = vpop.f32.mrf.mxu0 }
 0x274   : > { %v1076_v34 = vadd.f32 %v1075_v33, %v1074_v31 }
 0x275   : > { %v1077_v37 = vpop.f32.mrf.mxu0 }
 0x276   : > { %v660_v40 = vadd.f32 %v1076_v34, %v1030_v32 }
 0x277   : > { %v1078_v41 = vpop.f32.mrf.mxu0 }
 0x278   : > { %v678_v42 = vmax.f32 %v660_v40, 0.0  ;;  %v1079_v43 = vadd.f32 %v1078_v41, %v1077_v37 }
 0x279   : > { %v1080_v44 = vpop.f32.mrf.mxu0 }
 0x27a   : > { %839 = vst [vmem:[%s430_s25] sm:$0xff] %v678_v42  ;;  %v665_v45 = vadd.f32 %v1079_v43, %v1030_v32  ;;  %791 = vmatmul.mubr.f32.vlgmr.msra.gmra.mxu1 %v678_v42 }
 0x27b   : > { %v1081_v46 = vpop.f32.mrf.mxu0  ;;  %796 = vmatprep.mubr.f32.mxu1 %v1367_v30 }
 0x27c   : > { %v679_v47 = vmax.f32 %v665_v45, 0.0  ;;  %v1082_v48 = vadd.f32 %v1081_v46, %v1080_v44 }
 0x27d   : > { %v1083_v49 = vpop.f32.mrf.mxu0 }
 0x27e   : > { %840 = vst [vmem:[%s430_s25 + $0x8] sm:$0xff] %v679_v47  ;;  %v670_v50 = vadd.f32 %v1082_v48, %v1030_v32  ;;  %797 = vmatmul.mubr.f32.gmra.mxu1 %v679_v47 }
 0x27f   : > { %v1084_v51 = vpop.f32.mrf.mxu0  ;;  %802 = vmatprep.mubr.f32.mxu1 %v1367_v30 }
 0x280   : > { %v680_v52 = vmax.f32 %v670_v50, 0.0  ;;  %v1085_v55 = vadd.f32 %v1084_v51, %v1083_v49 }
 0x282   : > { %841 = vst [vmem:[%s430_s25 + $0x10] sm:$0xff] %v680_v52  ;;  %v675_v56 = vadd.f32 %v1085_v55, %v1030_v32  ;;  %803 = vmatmul.mubr.f32.gmra.mxu1 %v680_v52 }
 0x283   : > { %808 = vmatprep.mubr.f32.mxu1 %v1367_v30 }
 0x284   : > { %v681_v57 = vmax.f32 %v675_v56, 0.0 }
 0x286   : > { %842 = vst [vmem:[%s430_s25 + $0x18] sm:$0xff] %v681_v57  ;;  %809 = vmatmul.mubr.f32.gmra.mxu1 %v681_v57 }
 0x287   : > { %1294 = shalt.err (!%p1291_p7)
}
 0x288   : > { %s1295_s11 = scalar_lea.hbm %s1682_s26, 512  ;;  %s1299_s27 = scalar_lea.hbm %s1760_s9, 2048 }
 0x289   : > { %p1296_p2 = scmp.ne.s32.totalorder %s1682_s26, %s1295_s11  ;;  %p1300_p10 = scmp.lt.s32.totalorder %s1682_s26, %s1760_s9 }
 0x28a   : > { %p1301_p0 = scmp.lt.s32.totalorder %s1299_s27, %s1295_s11 }
 0x28b   : > { %p1297_p13 = pnand %p1296_p2, %p1794_p5 }
 0x28c   : > { %p1302_p6 = por %p1301_p0, %p1300_p10 }
 0x28d   : > { %p1298_p8 = pneg %p1297_p13 }
 0x28f   : > { %p1303_p11 = pnand %p1302_p6, %p1298_p8 }
 0x291   : > { %1306 = shalt.err (!%p1303_p11)
}
 0x292   : > { %s1369_s24 = smov 128   ;;  %s1370_s4 = smov 8   ;;  %v714_v58 = vld [vmem:[%s1758_s7] sm:$0x3]  ;;  %v816_v1 = vld [vmem:[%s1604_s17 + $0x8] sm:$0xff]  ;;  %v817_v4 = vld [vmem:[%s1604_s17 + $0x10] sm:$0xff] }
 0x293   : > { %1098 = dma.vmem_to_hbm [thread:$0]  (%p1794_p5), %s1676_s19, 512, %s1682_s26, %s850_s21, %s1369_s24, %s1369_s24, %s1370_s4   ;;  %v719_v59 = vrot.slane %v714_v58, %v1650_v53  ;;  %v723_v60 = vrot.slane %v714_v58, %v1652_v54 }
 0x294   : > { %s1027_s22 = sshll.u32 %s1442_s13, 2  ;;  %v815_v62 = vld [vmem:[%s1604_s17] sm:$0xff]  ;;  %v818_v7 = vld [vmem:[%s1604_s17 + $0x18] sm:$0xff]  ;;  %v820_v13 = vld [vmem:[%s1604_s17 + $0x28] sm:$0xff] }
 0x295   : > { %p434_p9 = scmp.lt.s32.totalorder %s1027_s22, 15  ;;  %v819_v10 = vld [vmem:[%s1604_s17 + $0x20] sm:$0xff]  ;;  %v821_v36 = vld [vmem:[%s1604_s17 + $0x30] sm:$0xff]  ;;  %v822_v17 = vld [vmem:[%s1604_s17 + $0x38] sm:$0xff] }
 0x297   : > { %s1802_s22 = smov (!%p434_p9, %s1027_s22), 15 }
 0x298   : > { %s1040_s15 = sshll.u32 %s1802_s22, 4 }
 0x299   : > { %s1717_s13 = scalar_lea.vmem %s1759_s8, %s1040_s15 }
 0x33a   : > { %v792_v61 = vpop.f32.mrf.mxu1 }
 0x33b   : > { %v793_v63 = vadd.f32 %v792_v61, %v719_v59 }
 0x33c   : > { %v794_v0 = vpop.f32.mrf.mxu1 }
 0x33d   : > { %v823_v2 = vadd.f32 %v815_v62, %v793_v63  ;;  %v795_v53 = vadd.f32 %v794_v0, %v723_v60 }
 0x33e   : > { %v798_v3 = vpop.f32.mrf.mxu1 }
 0x33f   : > { %831 = vst [vmem:[%s1717_s13] sm:$0xff] %v823_v2  ;;  %v824_v54 = vadd.f32 %v816_v1, %v795_v53  ;;  %v799_v5 = vadd.f32 %v798_v3, %v719_v59 }
 0x340   : > { %v800_v6 = vpop.f32.mrf.mxu1 }
 0x341   : > { %832 = vst [vmem:[%s1717_s13 + $0x8] sm:$0xff] %v824_v54  ;;  %v825_v8 = vadd.f32 %v817_v4, %v799_v5  ;;  %v801_v24 = vadd.f32 %v800_v6, %v723_v60 }
 0x342   : > { %v804_v9 = vpop.f32.mrf.mxu1 }
 0x343   : > { %833 = vst [vmem:[%s1717_s13 + $0x10] sm:$0xff] %v825_v8  ;;  %v826_v11 = vadd.f32 %v818_v7, %v801_v24  ;;  %v805_v23 = vadd.f32 %v804_v9, %v719_v59 }
 0x344   : > { %v806_v12 = vpop.f32.mrf.mxu1 }
 0x345   : > { %834 = vst [vmem:[%s1717_s13 + $0x18] sm:$0xff] %v826_v11  ;;  %v827_v14 = vadd.f32 %v819_v10, %v805_v23  ;;  %v807_v15 = vadd.f32 %v806_v12, %v723_v60 }
 0x346   : > { %v810_v16 = vpop.f32.mrf.mxu1 }
 0x347   : > { %835 = vst [vmem:[%s1717_s13 + $0x20] sm:$0xff] %v827_v14  ;;  %v828_v35 = vadd.f32 %v820_v13, %v807_v15  ;;  %v811_v26 = vadd.f32 %v810_v16, %v719_v59 }
 0x348   : > { %v812_v25 = vpop.f32.mrf.mxu1 }
 0x349   : > { %836 = vst [vmem:[%s1717_s13 + $0x28] sm:$0xff] %v828_v35  ;;  %v829_v18 = vadd.f32 %v821_v36, %v811_v26  ;;  %v813_v19 = vadd.f32 %v812_v25, %v723_v60 }
 0x34b   : > { %837 = vst [vmem:[%s1717_s13 + $0x30] sm:$0xff] %v829_v18  ;;  %v830_v20 = vadd.f32 %v822_v17, %v813_v19 }
 0x34d   : > { %838 = vst [vmem:[%s1717_s13 + $0x38] sm:$0xff] %v830_v20 }
 0x34e PF: > { %p1123_p5 = scmp.ge.s32.totalorder %s1357_s12, 2  ;;  %s891_s19 = sand.u32 1, %s1345_s30  }
 0x34f   : > { %p1795_p12 = scmp.ne.s32.totalorder %s1776_s16, 0  ;;  %s892_s26 = scalar_lea.sflag [#allocation4], %s891_s19 }
 0x351   : > { %p1115_p3 = pnand %p1123_p5, %p1795_p12 }
 0x353   : > { %p1116_p1 = pneg %p1115_p3 }
 0x355   : > { %1340 = dma.done.wait (%p1116_p1), %s892_s26, 512  }
 0x356   : > { %1342 = vsyncadd (%p1116_p1), %s892_s26, 4294966784  ;;  %s1796_s12 = sld [smem:[#allocation17_spill]]  ;;  %s1799_s30 = smov %s1349_s10 }
 0x357   : > { %s1797_s17 = sld [smem:[#allocation16_spill]] }
 0x358   : > { %s1798_s11 = sld [smem:[#allocation18_spill]] }
 0x35c   : > { %p27_p4 = scmp.ge.s32.totalorder %s1796_s12, 6  }
 0x35d   : > { %s1800_s10 = smov %s1797_s17 }
 0x35e   :  { %29 = sbr.rel (!%p27_p4) target bundleno = 12 (0xc), region = 130 }
 0x363   :  { %897 = vsyncpa [#allocation3], 1 }
 0x364   :  { %899 = vsyncpa [#allocation3 + $0x1], 1 }
 0x365   :  { %900 = vsyncpa [#allocation6], 1 }
 0x366   :  { %902 = vsyncpa [#allocation6 + $0x1], 1 }
 0x367   :  { %903 = vsyncpa [#allocation9], 1 }
 0x368   :  { %904 = vsyncpa [#allocation4], 1 }
 0x369   :  { %906 = vsyncpa [#allocation4 + $0x1], 1 }

</bundles_post_ra>
